<compile_context>
chip_gen: v6e
topology: v6e:2x2x1
jax: 0.10.0
libtpu: 0.0.40
codegen_flags: <defaults>
</compile_context>

<pallas_src>
import functools
import math

import jax
import jax.numpy as jnp
from jax.experimental import pallas as pl
from jax.experimental.pallas import tpu as pltpu


def _round_up(x, m):
    return (x + m - 1) // m * m


_VMEM_LIMIT = 48 * 1024 * 1024   # above default scoped limits, below physical on all gens


# ----------------------------------------------------------------------------
# Kernel 1: fused K/Q/V projection, all node types batched into one launch
# ----------------------------------------------------------------------------
def _proj_kernel(h_ref, w_ref, b_ref, kqv_ref):
    # single (tile, in_dim) @ (in_dim, 3*out_dim) MXU matmul, f32 accumulation
    acc = jnp.dot(h_ref[...], w_ref[...], preferred_element_type=jnp.float32)
    kqv_ref[...] = (acc + b_ref[...]).astype(kqv_ref.dtype)


def hgt_project(h_all, w_all, b_all, *, tile):
    T, n_pad, in_dim = h_all.shape
    out3 = w_all.shape[2]
    return pl.pallas_call(
        _proj_kernel,
        grid=(T, n_pad // tile),
        in_specs=[
            pl.BlockSpec((None, tile, in_dim), lambda t, i: (t, i, 0)),
            pl.BlockSpec((None, in_dim, out3), lambda t, i: (t, 0, 0)),
            pl.BlockSpec((None, 1, out3), lambda t, i: (t, 0, 0)),
        ],
        out_specs=pl.BlockSpec((None, tile, out3), lambda t, i: (t, i, 0)),
        out_shape=jax.ShapeDtypeStruct((T, n_pad, out3), jnp.bfloat16),
        compiler_params=pltpu.CompilerParams(
            dimension_semantics=("parallel", "parallel")),
    )(h_all, w_all, b_all)


# ----------------------------------------------------------------------------
# Kernel 2: relation transforms, hoisted out of the attention loop (once/etype)
# ----------------------------------------------------------------------------
def _rel_kernel(src_idx_ref, k_ref, v_ref, att_ref, msg_ref, kr_ref, vr_ref):
    del src_idx_ref  # consumed by the index maps only
    f32 = jnp.float32
    kr_ref[...] = jnp.einsum('hnd,hde->hne', k_ref[...], att_ref[...],
                             preferred_element_type=f32).astype(kr_ref.dtype)
    vr_ref[...] = jnp.einsum('hnd,hde->hne', v_ref[...], msg_ref[...],
                             preferred_element_type=f32).astype(vr_ref.dtype)


def hgt_relation_transform(src_idx, k_heads, v_heads, att_all, msg_all, *, tile):
    T, H, n_pad, d_k = k_heads.shape
    E = att_all.shape[0]
    grid_spec = pltpu.PrefetchScalarGridSpec(
        num_scalar_prefetch=1,
        grid=(E, n_pad // tile),
        in_specs=[
            # K / V of the etype's source node type, selected via scalar prefetch
            pl.BlockSpec((None, H, tile, d_k), lambda e, i, s: (s[e], 0, i, 0)),
            pl.BlockSpec((None, H, tile, d_k), lambda e, i, s: (s[e], 0, i, 0)),
            # per-etype relation params (pri/sqrt_dk folded into att on host)
            pl.BlockSpec((None, H, d_k, d_k), lambda e, i, s: (e, 0, 0, 0)),
            pl.BlockSpec((None, H, d_k, d_k), lambda e, i, s: (e, 0, 0, 0)),
        ],
        out_specs=[
            pl.BlockSpec((None, H, tile, d_k), lambda e, i, s: (e, 0, i, 0)),
            pl.BlockSpec((None, H, tile, d_k), lambda e, i, s: (e, 0, i, 0)),
        ],
    )
    out_sd = jax.ShapeDtypeStruct((E, H, n_pad, d_k), jnp.bfloat16)
    return pl.pallas_call(
        _rel_kernel,
        grid_spec=grid_spec,
        out_shape=[out_sd, out_sd],
        compiler_params=pltpu.CompilerParams(
            dimension_semantics=("arbitrary", "parallel")),
    )(src_idx, k_heads, v_heads, att_all, msg_all)


# ----------------------------------------------------------------------------
# Kernel 3: per-dst-type fused attention (flash/online softmax over src tiles)
#           + cross-etype mean + skip mixing, lane-dense output
# ----------------------------------------------------------------------------
def _attn_kernel(eidx_ref, q_ref, kr_ref, vr_ref, adj_ref, hskip_ref, alpha_ref,
                 out_ref, m_sc, l_sc, acc_sc, t_sc,
                 *, n_heads, d_k, inv_num_etypes):
    del eidx_ref  # consumed by the index maps only
    f32 = jnp.float32
    bf16 = jnp.bfloat16
    e = pl.program_id(1)
    s = pl.program_id(2)
    last_e = pl.num_programs(1) - 1
    last_s = pl.num_programs(2) - 1

    @pl.when(jnp.logical_and(e == 0, s == 0))
    def _():
        t_sc[...] = jnp.zeros_like(t_sc)

    @pl.when(s == 0)
    def _():
        m_sc[...] = jnp.full_like(m_sc, -jnp.inf)
        l_sc[...] = jnp.zeros_like(l_sc)
        acc_sc[...] = jnp.zeros_like(acc_sc)

    # scores for this (dst tile, src tile): (H, tile_d, tile_s).
    # relation_pri / sqrt(d_k) is already folded into k_rel.
    sc = jnp.einsum('hqd,hkd->hqk', q_ref[...], kr_ref[...],
                    preferred_element_type=f32)
    # additive mask built in-kernel from int8 adjacency (0/1): no dense bias DMA
    adjf = adj_ref[...].astype(f32)
    sc = sc + jnp.where(adjf > 0.0, 0.0, -1e30)

    # online (flash-style) softmax over the src axis == edge_softmax(norm_by='dst')
    m_prev = m_sc[...]
    m_new = jnp.maximum(m_prev, jnp.max(sc, axis=-1, keepdims=True))
    corr = jnp.exp(m_prev - m_new)
    p = jnp.exp(sc - m_new)
    l_sc[...] = corr * l_sc[...] + jnp.sum(p, axis=-1, keepdims=True)
    acc_sc[...] = corr * acc_sc[...] + jnp.einsum(
        'hqk,hkd->hqd', p.astype(bf16), vr_ref[...], preferred_element_type=f32)
    m_sc[...] = m_new

    # finished this etype: normalize and accumulate for the cross-etype mean
    @pl.when(s == last_s)
    def _():
        t_sc[...] += acc_sc[...] * pl.reciprocal(l_sc[...], approx=True)

    # last etype: cross_reducer='mean' + skip mixing, single lane-dense store
    @pl.when(jnp.logical_and(e == last_e, s == last_s))
    def _():
        a = alpha_ref[0]
        scale = (1.0 - a) * inv_num_etypes
        skip = hskip_ref[...] * a                       # (tile_d, out_dim)
        for h in range(n_heads):                        # static, tiny (heads)
            out_ref[:, h * d_k:(h + 1) * d_k] = (
                skip[:, h * d_k:(h + 1) * d_k] + t_sc[h] * scale)


def hgt_attention(eidx, q_heads, k_rel, v_rel, adj_nt, hskip_all, alpha,
                  *, dst_id, tile_d, tile_s, n_heads, d_k):
    T, H, n_pad, _ = q_heads.shape
    E_d = adj_nt.shape[0]
    out_dim = n_heads * d_k
    kernel = functools.partial(_attn_kernel, n_heads=n_heads, d_k=d_k,
                               inv_num_etypes=1.0 / E_d)
    grid_spec = pltpu.PrefetchScalarGridSpec(
        num_scalar_prefetch=1,
        grid=(n_pad // tile_d, E_d, n_pad // tile_s),
        in_specs=[
            # dst queries (head-major), resident across the (etype, src) axes
            pl.BlockSpec((None, H, tile_d, d_k),
                         lambda i, e, s, ei, d=dst_id: (d, 0, i, 0)),
            # precomputed relation-transformed K / V, selected by etype prefetch
            pl.BlockSpec((None, H, tile_s, d_k),
                         lambda i, e, s, ei: (ei[e], 0, s, 0)),
            pl.BlockSpec((None, H, tile_s, d_k),
                         lambda i, e, s, ei: (ei[e], 0, s, 0)),
            # int8 adjacency (dst, src) for this dst type's etypes
            pl.BlockSpec((None, tile_d, tile_s),
                         lambda i, e, s, ei: (e, i, s)),
            # original dst features (f32) for the skip connection
            pl.BlockSpec((None, tile_d, out_dim),
                         lambda i, e, s, ei, d=dst_id: (d, i, 0)),
            # alpha = sigmoid(skip[dst]) scalar
            pl.BlockSpec(memory_space=pltpu.MemorySpace.SMEM),
        ],
        out_specs=pl.BlockSpec((tile_d, out_dim), lambda i, e, s, ei: (i, 0)),
        scratch_shapes=[
            pltpu.VMEM((H, tile_d, 1), jnp.float32),    # running max
            pltpu.VMEM((H, tile_d, 1), jnp.float32),    # running denom
            pltpu.VMEM((H, tile_d, d_k), jnp.float32),  # per-etype flash acc
            pltpu.VMEM((H, tile_d, d_k), jnp.float32),  # cross-etype accumulator
        ],
    )
    return pl.pallas_call(
        kernel,
        grid_spec=grid_spec,
        out_shape=jax.ShapeDtypeStruct((n_pad, out_dim), jnp.float32),
        compiler_params=pltpu.CompilerParams(
            dimension_semantics=("parallel", "arbitrary", "arbitrary"),
            vmem_limit_bytes=_VMEM_LIMIT),
    )(eidx, q_heads, k_rel, v_rel, adj_nt, hskip_all, alpha)


# ----------------------------------------------------------------------------
# Forward-pass glue (parameter folding, padding, head-layout plumbing)
# ----------------------------------------------------------------------------
def hgt_layer_forward(canonical_etypes, node_dict, edge_dict, h, adj, params,
                      *, n_heads, d_k):
    ntypes = sorted(node_dict, key=node_dict.get)
    T = len(ntypes)
    in_dim = next(iter(h.values())).shape[1]
    out_dim = n_heads * d_k
    assert in_dim == out_dim, "skip connection requires in_dim == out_dim"
    sqrt_dk = math.sqrt(d_k)

    num_nodes = {nt: h[nt].shape[0] for nt in ntypes}
    n_pad = _round_up(max(num_nodes.values()), 8)
    tile = n_pad if n_pad <= 512 else 512
    n_pad = _round_up(n_pad, tile)

    # ---- fused, batched K/Q/V projections (one launch for all node types) ----
    h_all = jnp.zeros((T, n_pad, in_dim), jnp.bfloat16)
    hskip_all = jnp.zeros((T, n_pad, out_dim), jnp.float32)
    for nt in ntypes:
        t_id = node_dict[nt]
        h_all = h_all.at[t_id, :num_nodes[nt]].set(h[nt].astype(jnp.bfloat16))
        hskip_all = hskip_all.at[t_id, :num_nodes[nt]].set(h[nt])

    w_all = jnp.stack([
        jnp.concatenate([params['Wk'][node_dict[nt]],
                         params['Wq'][node_dict[nt]],
                         params['Wv'][node_dict[nt]]], axis=1)
        for nt in ntypes], axis=0).astype(jnp.bfloat16)
    b_all = jnp.stack([
        jnp.concatenate([params['bk'][node_dict[nt]],
                         params['bq'][node_dict[nt]],
                         params['bv'][node_dict[nt]]], axis=1)
        for nt in ntypes], axis=0).astype(jnp.float32)

    kqv = hgt_project(h_all, w_all, b_all, tile=tile)   # (T, n_pad, 3*out_dim)

    # layout plumbing (wrapper-side only): flat -> head-major (T, H, n_pad, d_k)
    def to_heads(x):
        return jnp.transpose(x.reshape(T, n_pad, n_heads, d_k), (0, 2, 1, 3))
    k_heads = to_heads(kqv[:, :, 0:out_dim])
    q_heads = to_heads(kqv[:, :, out_dim:2 * out_dim])
    v_heads = to_heads(kqv[:, :, 2 * out_dim:3 * out_dim])

    # ---- relation transforms hoisted out of the attention loop (once/etype) ----
    src_idx = jnp.asarray([node_dict[s] for (s, _, _) in canonical_etypes],
                          jnp.int32)
    att_all, msg_all = [], []
    for (srctype, etype, dsttype) in canonical_etypes:
        e_id = edge_dict[etype]
        pri = params['relation_pri'][e_id]                       # (H,)
        att_all.append(params['relation_att'][e_id]
                       * (pri / sqrt_dk)[:, None, None])         # exact fold
        msg_all.append(params['relation_msg'][e_id])
    att_all = jnp.stack(att_all, 0).astype(jnp.bfloat16)
    msg_all = jnp.stack(msg_all, 0).astype(jnp.bfloat16)

    k_rel, v_rel = hgt_relation_transform(src_idx, k_heads, v_heads,
                                          att_all, msg_all, tile=tile)

    # ---- per-dst-type fused attention + cross-etype mean + skip ----
    new_h = {}
    for nt in ntypes:
        d_id = node_dict[nt]
        ce = [(idx, s) for idx, (s, _, d) in enumerate(canonical_etypes)
              if d == nt]
        assert ce, "every node type must receive at least one edge type"
        n_dst = num_nodes[nt]

        eidx = jnp.asarray([idx for (idx, _) in ce], jnp.int32)
        adj_nt = jnp.zeros((len(ce), n_pad, n_pad), jnp.int8)
        for j, (idx, _srctype) in enumerate(ce):
            etype = canonical_etypes[idx][1]
            a = adj[etype]
            adj_nt = adj_nt.at[j, :a.shape[0], :a.shape[1]].set(
                (a > 0).astype(jnp.int8))

        alpha = jax.nn.sigmoid(params['skip'][d_id]).reshape(1).astype(jnp.float32)

        out = hgt_attention(eidx, q_heads, k_rel, v_rel, adj_nt, hskip_all,
                            alpha, dst_id=d_id, tile_d=tile, tile_s=tile,
                            n_heads=n_heads, d_k=d_k)
        new_h[nt] = out[:n_dst]
    return new_h


# ----------------------------------------------------------------------------
# Pure-JAX f32 reference (mirrors the PyTorch/DGL forward) for validation
# ----------------------------------------------------------------------------
def _reference_forward(canonical_etypes, node_dict, edge_dict, h, adj, params,
                       *, n_heads, d_k):
    sqrt_dk = math.sqrt(d_k)
    t_acc = {nt: [] for nt in node_dict}
    for (src, et, dst) in canonical_etypes:
        e_id = edge_dict[et]
        s_id = node_dict[src]
        d_id = node_dict[dst]
        k = (h[src] @ params['Wk'][s_id] + params['bk'][s_id]).reshape(-1, n_heads, d_k)
        v = (h[src] @ params['Wv'][s_id] + params['bv'][s_id]).reshape(-1, n_heads, d_k)
        q = (h[dst] @ params['Wq'][d_id] + params['bq'][d_id]).reshape(-1, n_heads, d_k)
        k = jnp.einsum('bij,ijk->bik', k, params['relation_att'][e_id])
        v = jnp.einsum('bij,ijk->bik', v, params['relation_msg'][e_id])
        s = jnp.einsum('dhc,shc->dsh', q, k) * params['relation_pri'][e_id] / sqrt_dk
        mask = adj[et][:, :, None] > 0
        s = jnp.where(mask, s, -jnp.inf)
        a = jax.nn.softmax(s, axis=1)
        a = jnp.where(mask, a, 0.0)
        t = jnp.einsum('dsh,shc->dhc', a, v).reshape(-1, n_heads * d_k)
        t_acc[dst].append(t)
    new_h = {}
    for nt, n_id in node_dict.items():
        alpha = jax.nn.sigmoid(params['skip'][n_id])
        t = jnp.mean(jnp.stack(t_acc[nt], 0), 0)
        new_h[nt] = t * (1 - alpha) + h[nt] * alpha
    return new_h


def linear_params(key, in_dim, out_dim):
    k1, k2 = jax.random.split(key)
    bound = 1.0 / math.sqrt(in_dim)
    w = jax.random.uniform(k1, (in_dim, out_dim), jnp.float32, -bound, bound)
    b = jax.random.uniform(k2, (1, out_dim), jnp.float32, -bound, bound)
    return w, b


if __name__ == "__main__":
    in_dim = 32
    out_dim = 32          # skip connection requires in_dim == out_dim
    n_heads = 4
    d_k = out_dim // n_heads

    node_dict = {'a': 0, 'b': 1}
    edge_dict = {'ab': 0, 'ba': 1, 'aa': 2}
    canonical_etypes = [('a', 'ab', 'b'), ('b', 'ba', 'a'), ('a', 'aa', 'a')]
    num_nodes = {'a': 16, 'b': 16}
    num_types = len(node_dict)
    num_relations = len(edge_dict)

    key = jax.random.PRNGKey(0)
    keys = jax.random.split(key, 64)
    ki = iter(range(64))

    # node features
    h = {nt: jax.random.normal(keys[next(ki)], (num_nodes[nt], in_dim), jnp.float32)
         for nt in node_dict}

    # dense adjacency masks (dst, src); guarantee every dst has >= 1 in-edge
    adj = {}
    for (src, et, dst) in canonical_etypes:
        a = (jax.random.uniform(keys[next(ki)],
                                (num_nodes[dst], num_nodes[src])) < 0.4)
        a = a.at[:, 0].set(True)
        adj[et] = a.astype(jnp.float32)

    # parameters (deterministic synthetic init, mirrors __init__ shapes)
    Wk, bk, Wq, bq, Wv, bv = [], [], [], [], [], []
    for _ in range(num_types):
        w, b = linear_params(keys[next(ki)], in_dim, out_dim); Wk.append(w); bk.append(b)
        w, b = linear_params(keys[next(ki)], in_dim, out_dim); Wq.append(w); bq.append(b)
        w, b = linear_params(keys[next(ki)], in_dim, out_dim); Wv.append(w); bv.append(b)
    xav = math.sqrt(6.0 / (d_k + d_k))
    params = {
        'Wk': Wk, 'bk': bk, 'Wq': Wq, 'bq': bq, 'Wv': Wv, 'bv': bv,
        'relation_pri': jnp.ones((num_relations, n_heads), jnp.float32),
        'relation_att': jax.random.uniform(keys[next(ki)],
                                           (num_relations, n_heads, d_k, d_k),
                                           jnp.float32, -xav, xav),
        'relation_msg': jax.random.uniform(keys[next(ki)],
                                           (num_relations, n_heads, d_k, d_k),
                                           jnp.float32, -xav, xav),
        'skip': jnp.ones((num_types,), jnp.float32),
    }

    new_h = hgt_layer_forward(canonical_etypes, node_dict, edge_dict, h, adj,
                              params, n_heads=n_heads, d_k=d_k)
    ref_h = _reference_forward(canonical_etypes, node_dict, edge_dict, h, adj,
                               params, n_heads=n_heads, d_k=d_k)
    for nt in node_dict:
        jax.block_until_ready(new_h[nt])
        assert new_h[nt].shape == (num_nodes[nt], out_dim)
        assert bool(jnp.all(jnp.isfinite(new_h[nt])))
        err = float(jnp.max(jnp.abs(new_h[nt] - ref_h[nt])))
        assert err < 0.15, f"max |kernel - reference| too large: {err}"
    print("KERNEL_OK")
</pallas_src>

<mosaic_0001>
module attributes {stable_mosaic.version = 11 : i64} {
  func.func @_proj_kernel(%arg0: i32, %arg1: i32, %arg2: memref<1x16x32xbf16, #tpu.memory_space<vmem>>, %arg3: memref<1x32x96xbf16, #tpu.memory_space<vmem>>, %arg4: memref<1x1x96xf32, #tpu.memory_space<vmem>>, %arg5: memref<1x16x96xbf16, #tpu.memory_space<vmem>>) attributes {dimension_semantics = [#tpu.dimension_semantics<parallel>, #tpu.dimension_semantics<parallel>], iteration_bounds = array<i64: 2, 1>, scalar_prefetch = 0 : i64, scratch_operands = 0 : i64, tpu.core_type = #tpu.core_type<tc>, window_params = [{transform_indices = @transform_0, window_bounds = array<i64: 1, 16, 32>}, {transform_indices = @transform_1, window_bounds = array<i64: 1, 32, 96>}, {transform_indices = @transform_2, window_bounds = array<i64: 1, 1, 96>}, {transform_indices = @transform_3, window_bounds = array<i64: 1, 16, 96>}]} {
    %c0 = arith.constant 0 : index
    %c0_0 = arith.constant 0 : index
    %c0_1 = arith.constant 0 : index
    %0 = vector.load %arg2[%c0, %c0_0, %c0_1] : memref<1x16x32xbf16, #tpu.memory_space<vmem>>, vector<1x16x32xbf16>
    %1 = vector.shape_cast %0 : vector<1x16x32xbf16> to vector<16x32xbf16>
    %c0_2 = arith.constant 0 : index
    %c0_3 = arith.constant 0 : index
    %c0_4 = arith.constant 0 : index
    %2 = vector.load %arg3[%c0_2, %c0_3, %c0_4] : memref<1x32x96xbf16, #tpu.memory_space<vmem>>, vector<1x32x96xbf16>
    %3 = vector.shape_cast %2 : vector<1x32x96xbf16> to vector<32x96xbf16>
    %cst = arith.constant dense<0.000000e+00> : vector<16x96xf32>
    %4 = tpu.matmul %1, %3, %cst {dimension_numbers = #tpu.dot_dimension_numbers<[1], [0], [0], [1], [0, 0, 1, 1], [], []>} : vector<16x32xbf16>, vector<32x96xbf16>, vector<16x96xf32> -> vector<16x96xf32>
    %c0_5 = arith.constant 0 : index
    %c0_6 = arith.constant 0 : index
    %c0_7 = arith.constant 0 : index
    %5 = vector.load %arg4[%c0_5, %c0_6, %c0_7] : memref<1x1x96xf32, #tpu.memory_space<vmem>>, vector<1x1x96xf32>
    %6 = vector.shape_cast %5 : vector<1x1x96xf32> to vector<1x96xf32>
    %7 = vector.broadcast %6 : vector<1x96xf32> to vector<16x96xf32>
    %8 = arith.addf %4, %7 : vector<16x96xf32>
    %9 = arith.truncf %8 : vector<16x96xf32> to vector<16x96xbf16>
    %c0_8 = arith.constant 0 : index
    %c0_9 = arith.constant 0 : index
    %c0_10 = arith.constant 0 : index
    %10 = vector.load %arg5[%c0_8, %c0_9, %c0_10] : memref<1x16x96xbf16, #tpu.memory_space<vmem>>, vector<1x16x96xbf16>
    %11 = vector.shape_cast %10 : vector<1x16x96xbf16> to vector<16x96xbf16>
    %12 = vector.shape_cast %9 : vector<16x96xbf16> to vector<1x16x96xbf16>
    tpu.vector_store %arg5[%c0_8, %c0_9, %c0_10], %12 {strides = array<i32>} : memref<1x16x96xbf16, #tpu.memory_space<vmem>>, vector<1x16x96xbf16>,
    return
  }
  func.func @transform_0(%arg0: i32, %arg1: i32) -> (i32, i32, i32) {
    %c0_i32 = arith.constant 0 : i32
    %c0_i32_0 = arith.constant 0 : i32
    return %arg0, %arg1, %c0_i32 : i32, i32, i32
  }
  func.func @transform_1(%arg0: i32, %arg1: i32) -> (i32, i32, i32) {
    %c0_i32 = arith.constant 0 : i32
    %c0_i32_0 = arith.constant 0 : i32
    %c0_i32_1 = arith.constant 0 : i32
    return %arg0, %c0_i32, %c0_i32_0 : i32, i32, i32
  }
  func.func @transform_2(%arg0: i32, %arg1: i32) -> (i32, i32, i32) {
    %c0_i32 = arith.constant 0 : i32
    %c0_i32_0 = arith.constant 0 : i32
    %c0_i32_1 = arith.constant 0 : i32
    return %arg0, %c0_i32, %c0_i32_0 : i32, i32, i32
  }
  func.func @transform_3(%arg0: i32, %arg1: i32) -> (i32, i32, i32) {
    %c0_i32 = arith.constant 0 : i32
    %c0_i32_0 = arith.constant 0 : i32
    return %arg0, %arg1, %c0_i32 : i32, i32, i32
  }
}

</mosaic_0001>

<bundles_post_ra>
// kernel: tpu_custom_call.1
= control target key start
LH: loop header
LB: loop body
LE: loop exit
PB: predicated region body
PF: predicated region fallthrough
CT: control target
= control target key end

     0   :  { %s959_s0 = inlined_call_operand.hbm [shape: bf16[2,16,32], index: 0, kind: input, shape index: {}]   ;;  %s960_s1 = inlined_call_operand.hbm [shape: bf16[2,32,96], index: 1, kind: input, shape index: {}]   ;;  %s961_s2 = inlined_call_operand.vmem [shape: f32[2,1,96], index: 2, kind: input, shape index: {}]   ;;  %s962_s3 = inlined_call_operand.hbm [shape: bf16[2,16,96], index: 3, kind: output, shape index: {}]  }
   0x1   :  { %963 = sst [smem:[#allocation11_spill]] %s959_s0 }
   0x2   :  { %8 = vsyncpa [#allocation3], 0 }
   0x3   :  { %10 = vsyncpa [#allocation3 + $0x1], 0 }
   0x4   :  { %11 = vsyncpa [#allocation6], 0 }
   0x5   :  { %13 = vsyncpa [#allocation6 + $0x1], 0 }
   0x6   :  { %14 = vsyncpa [#allocation4], 0 }
   0x7   :  { %16 = vsyncpa [#allocation4 + $0x1], 0  ;;  %s774_s12 = smov 0   ;;  %s776_s13 = smov 0  }
   0x8   :  { %s778_s14 = smov 0   ;;  %s780_s15 = smov 0  }
   0x9   :  { %s782_s16 = smov 0   ;;  %s784_s17 = smov 0  }
   0xa LB: > { %s485_s18 = sadd.s32 4294967295, %s743_s17   ;;  %s486_s19 = sadd.s32 4294967294, %s743_s17   ;;  %s743_s17 = sphi %s784_s17, %s22_s17   ;;  %s739_s16 = sphi %s782_s16, %s975_s16   ;;  %s735_s15 = sphi %s780_s15, %s974_s15   ;;  %s731_s14 = sphi %s778_s14, %s973_s14   ;;  %s727_s13 = sphi %s776_s13, %s972_s13   ;;  %s723_s12 = sphi %s774_s12, %s971_s12  }
   0xb   : > { %s34_s20 = sadd.s32 1, %s739_s16  ;;  %s43_s21 = sadd.s32 1, %s731_s14 }
   0xc   : > { %p36_p0 = scmp.ge.s32.totalorder %s34_s20, 2  ;;  %p50_p1 = scmp.ne.s32.totalorder %s731_s14, %s727_s13 }
   0xd   : > { %p51_p2 = scmp.eq.s32.totalorder %s743_s17, 0  ;;  %p56_p3 = scmp.ne.s32.totalorder %s727_s13, %s723_s12 }
   0xe   : > { %s977_s20 = smov (%p36_p0, %s34_s20), 0  ;;  %p57_p5 = scmp.eq.s32.totalorder %s485_s18, 0 }
   0xf   : > { %p815_p4 = por %p51_p2, %p50_p1  ;;  %s38_s23 = ssub.s32 %s739_s16, %s977_s20 }
  0x10   : > { %p134_p6 = scmp.eq.s32.totalorder %s485_s18, 1  ;;  %p41_p7 = scmp.eq.s32.totalorder %s38_s23, 0 }
  0x11   : > { %p821_p8 = por %p57_p5, %p56_p3  ;;  %p140_p10 = scmp.eq.s32.totalorder %s486_s19, 1 }
  0x12   : > { %p825_p9 = por %p134_p6, %p50_p1  ;;  %p488_p12 = scmp.ge.s32.totalorder %s743_s17, 2 }
  0x13   : > { %s830_s26 = scalar_select %p41_p7, %s731_s14, %s43_s21  }
  0x14   : > { %p832_p11 = por %p140_p10, %p56_p3  ;;  %p544_p13 = scmp.lt.s32.totalorder %s743_s17, 2 }
  0x15   : > { %s839_s28 = sand.u32 1, %s731_s14   ;;  %s511_s30 = sshll.u32 %s739_s16, 7 }
  0x16   : > { %s489_s29 = sshll.u32 %s839_s28, 3  ;;  %s968_s0 = sld [smem:[#allocation11_spill]] }
  0x17   : > { %s164_s7 = scalar_lea.vmem [#allocation2], %s489_s29  ;;  %p848_p0 = pnand %p544_p13, %p815_p4 }
  0x18   : > { %s173_s8 = sshll.u32 %s164_s7, 4  ;;  %p495_p1 = scmp.ge.s32.totalorder %s743_s17, 1  ;;  %s174_s8 = int_to_ptr.vmem [resolvable:$true] %s173_s8 }
  0x19   : > { %s161_s10 = scalar_lea.sflag [#allocation3], %s839_s28  ;;  %p605_p2 = pneg %p848_p0 }
  0x1a   : > { %s616_s11 = scalar_lea.vmem %s174_s8, 128  ;;  %s745_s18 = smov [#allocation2]  }
  0x1b   : > { %p617_p3 = scmp.ne.s32.totalorder %s174_s8, %s616_s11  ;;  %s621_s19 = sshll.u32 %s745_s18, 4  ;;  %s622_s19 = int_to_ptr.vmem [resolvable:$false] %s621_s19 }
  0x1c   : > { %s172_s6 = scalar_lea.hbm %s968_s0, %s511_s30  ;;  %s623_s21 = scalar_lea.vmem %s622_s19, 256 }
  0x1d   : > { %p619_p5 = pnand %p617_p3, %p605_p2  ;;  %p624_p4 = scmp.lt.s32.totalorder %s174_s8, %s622_s19 }
  0x1e   : > { %p625_p7 = scmp.lt.s32.totalorder %s623_s21, %s616_s11 }
  0x1f   : > { %p620_p6 = pneg %p619_p5 }
  0x20   : > { %p626_p10 = por %p625_p7, %p624_p4 }
  0x22   : > { %p627_p13 = pnand %p626_p10, %p620_p6 }
  0x24   : > { %630 = shalt.err (!%p627_p13)
}
  0x25   : > { %s746_s22 = smov 64   ;;  %s747_s23 = smov 4  }
  0x26   : > { %536 = dma.hbm_to_vmem [thread:$0]  (!%p848_p0), %s172_s6, 128, %s174_s8, %s161_s10, %s746_s22, %s746_s22, %s747_s23  }
  0x27   : > { %p208_p3 = scmp.lt.s32.totalorder %s743_s17, 3  ;;  %s492_s29 = sshll.u32 %s839_s28, 4 }
  0x28   : > { %s512_s30 = sshll.u32 %s739_s16, 8  ;;  %s187_s18 = scalar_lea.vmem [#allocation5], %s492_s29 }
  0x29   : > { %p866_p5 = pnand %p495_p1, %p208_p3  ;;  %s193_s11 = scalar_lea.hbm %s960_s1, %s512_s30 }
  0x2a   : > { %s194_s19 = sshll.u32 %s187_s18, 4  ;;  %s184_s21 = scalar_lea.sflag [#allocation6], %s839_s28  ;;  %s195_s19 = int_to_ptr.vmem [resolvable:$true] %s194_s19 }
  0x2b   : > { %s644_s0 = scalar_lea.vmem %s195_s19, 256  ;;  %s748_s6 = smov [#allocation5]  }
  0x2c   : > { %p645_p6 = scmp.ne.s32.totalorder %s195_s19, %s644_s0  ;;  %s649_s8 = sshll.u32 %s748_s6, 4  ;;  %s650_s8 = int_to_ptr.vmem [resolvable:$false] %s649_s8 }
  0x2d   : > { %s651_s10 = scalar_lea.vmem %s650_s8, 512  ;;  %p652_p1 = scmp.lt.s32.totalorder %s195_s19, %s650_s8 }
  0x2e   : > { %p647_p4 = pnand %p645_p6, %p605_p2  ;;  %p653_p10 = scmp.lt.s32.totalorder %s651_s10, %s644_s0 }
  0x30   : > { %p648_p7 = pneg %p647_p4  ;;  %p654_p13 = por %p653_p10, %p652_p1 }
  0x32   : > { %p655_p3 = pnand %p654_p13, %p648_p7 }
  0x34   : > { %658 = shalt.err (!%p655_p3)
}
  0x35   : > { %539 = dma.hbm_to_vmem [thread:$0]  (!%p848_p0), %s193_s11, 256, %s195_s19, %s184_s21, %s746_s22, %s746_s22, %s747_s23  }
  0x36   : > { %212 = sbr.rel (%p866_p5) target bundleno = 287 (0x11f), region = 32  ;;  %s882_s28 = sand.u32 (!%p866_p5), 1, %s727_s13  }
  0x37   : > { %s496_s29 = sshll.u32 (!%p866_p5), %s882_s28, 3  ;;  %s215_s30 = scalar_lea.sflag (!%p866_p5), [#allocation3], %s882_s28 }
  0x38   : > { %s218_s0 = scalar_lea.vmem (!%p866_p5), [#allocation2], %s496_s29 }
  0x3b   : > { %710 = dma.done.wait (%p821_p8), %s215_s30, 128  }
  0x3c   : > { %712 = vsyncadd (%p821_p8), %s215_s30, 4294967168  ;;  %s497_s9 = sshll.u32 %s882_s28, 4  ;;  %s224_s22 = scalar_lea.sflag [#allocation6], %s882_s28 }
  0x3d   : > { %s227_s23 = scalar_lea.vmem [#allocation5], %s497_s9 }
  0x3e   : > { %714 = dma.done.wait (%p821_p8), %s224_s22, 256  }
  0x3f   : > { %716 = vsyncadd (%p821_p8), %s224_s22, 4294967040  ;;  %v749_v0 = vmov 0.0   ;;  %vm750_vm0 = vmmov 0   ;;  %v600_v1 = vld [vmem:[%s227_s23 + $0x8] sm:$0xff]   ;;  %v601_v2 = vld [vmem:[%s227_s23] sm:$0xff]   ;;  %vm294_vm1 = vcmask 261120  }
  0x40   : > { %519 = vmatprep.subr.bf16.mxu0 %v749_v0  ;;  %523 = vmatprep.mubr.msk.bf16.mxu0 %vm750_vm0, %v749_v0  ;;  %v602_v3 = vld [vmem:[%s218_s0] sm:$0xff]   ;;  %p259_p0 = scmp.lt.s32.totalorder %s735_s15, 1  ;;  %vm347_vm2 = vcmask 781312   ;;  %s257_s11 = scalar_lea.vmem [#allocation7], %s496_s29 }
  0x41   : > { %520 = vmatpush3.bf16.msra.mxu0 %v600_v1  ;;  %s366_s18 = sshll.u32 %s257_s11, 4  ;;  %s515_s19 = sshll.u32 %s735_s15, 7  ;;  %s911_s18 = int_to_ptr.vmem [resolvable:$true] %s366_s18 }
  0x42   : > { %521 = vmatprep.subr.bf16.mxu0 %v749_v0  ;;  %s260_s4 = scalar_select %p259_p0, %s735_s15, 1 }
  0x43   : > { %s909_s8 = scalar_lea.hbm %s962_s3, %s515_s19  ;;  %s351_s10 = scalar_lea.sflag [#allocation4], %s882_s28 }
  0x44   : > { %s261_s7 = scalar_lea.vmem %s961_s2, %s260_s4  ;;  %s659_s29 = scalar_lea.vmem %s911_s18, 128 }
  0x45   : > { %522 = vmatpush3.bf16.msra.mxu0 %v601_v2  ;;  %v499_v4 = vld [vmem:[%s261_s7] ss:$0 sm:$0xff]  ;;  %p660_p8 = scmp.ne.s32.totalorder %s911_s18, %s659_s29  ;;  %s751_s15 = smov [#allocation7]  }
  0x46   : > { %s663_s30 = sshll.u32 %s751_s15, 4  ;;  %s664_s30 = int_to_ptr.vmem [resolvable:$false] %s663_s30 }
  0x47   : > { %p661_p2 = pnand %p660_p8, %p825_p9  ;;  %s665_s0 = scalar_lea.vmem %s664_s30, 256 }
  0x48   : > { %524 = vmatmul.mubr.msk.bf16.vlgmr.msra.gmra.mxu0 %vm294_vm1, %v602_v3  ;;  %p666_p6 = scmp.lt.s32.totalorder %s911_s18, %s664_s30  ;;  %p667_p4 = scmp.lt.s32.totalorder %s665_s0, %s659_s29 }
  0x49   : > { %p662_p5 = pneg %p661_p2 }
  0x4a   : > { %p668_p7 = por %p667_p4, %p666_p6 }
  0x4c   : > { %p669_p1 = pnand %p668_p7, %p662_p5 }
 0x108   : > { %v332_v5 = vpop.f32.mrf.mxu0 }
 0x109   : > { %v333_v6 = vadd.f32 %v499_v4, %v332_v5 }
 0x10a   : > { %v525_v7 = vpop.f32.mrf.mxu0 }
 0x10b   : > { %v513_v8 = vpack.c.bf16 %v333_v6, %v333_v6 }
 0x10c   : > { %v335_v9 = vpop.f32.mrf.mxu0 }
 0x10d   : > { %348 = vst.msk [vmem:[%s257_s11] sm:$0xf] %vm347_vm2, %v513_v8  ;;  %v336_v10 = vadd.f32 %v499_v4, %v335_v9 }
 0x10e   : > { %v526_v11 = vpop.f32.mrf.mxu0 }
 0x10f   : > { %v514_v12 = vpack.c.bf16 %v336_v10, %v336_v10 }
 0x111   : > { %349 = vst.msk [vmem:[%s257_s11 + $0x4] sm:$0xf] %vm347_vm2, %v514_v12 }
 0x112   : > { %672 = shalt.err (!%p669_p1)
}
 0x113   : > { %s673_s9 = scalar_lea.hbm %s909_s8, 128  ;;  %s677_s4 = scalar_lea.hbm %s962_s3, 256 }
 0x114   : > { %p674_p10 = scmp.ne.s32.totalorder %s909_s8, %s673_s9  ;;  %p678_p0 = scmp.lt.s32.totalorder %s909_s8, %s962_s3 }
 0x115   : > { %p679_p8 = scmp.lt.s32.totalorder %s677_s4, %s673_s9 }
 0x116   : > { %p675_p13 = pnand %p674_p10, %p825_p9 }
 0x117   : > { %p680_p2 = por %p679_p8, %p678_p0 }
 0x118   : > { %p676_p3 = pneg %p675_p13 }
 0x11a   : > { %p681_p5 = pnand %p680_p2, %p676_p3 }
 0x11c   : > { %684 = shalt.err (!%p681_p5)
}
 0x11d   : > { %s752_s7 = smov 64   ;;  %s753_s11 = smov 4  }
 0x11e   : > { %531 = dma.vmem_to_hbm [thread:$0]  (%p825_p9), %s911_s18, 128, %s909_s8, %s351_s10, %s752_s7, %s752_s7, %s753_s11  }
 0x11f PF: > { %s381_s19 = sand.u32 1, %s723_s12   ;;  %p541_p6 = pnand %p488_p12, %p832_p11 }
 0x120   : > { %s382_s21 = scalar_lea.sflag [#allocation4], %s381_s19 }
 0x121   : > { %p542_p4 = pneg %p541_p6 }
 0x123   : > { %718 = dma.done.wait (%p542_p4), %s382_s21, 128  }
 0x124   : > { %720 = vsyncadd (%p542_p4), %s382_s21, 4294967168  ;;  %s22_s17 = sadd.s32 1, %s743_s17   ;;  %s971_s12 = smov %s727_s13 }
 0x125   : > { %p19_p7 = scmp.ge.s32.totalorder %s22_s17, 4   ;;  %s972_s13 = smov %s731_s14 }
 0x126   : > { %s973_s14 = smov %s830_s26  ;;  %s974_s15 = smov %s739_s16 }
 0x127   : > { %s975_s16 = smov %s977_s20  ;;  %21 = sbr.rel (!%p19_p7) target bundleno = 10 (0xa), region = 93 }
 0x12c   :  { %387 = vsyncpa [#allocation3], 1 }
 0x12d   :  { %389 = vsyncpa [#allocation3 + $0x1], 1 }
 0x12e   :  { %390 = vsyncpa [#allocation6], 1 }
 0x12f   :  { %392 = vsyncpa [#allocation6 + $0x1], 1 }
 0x130   :  { %393 = vsyncpa [#allocation4], 1 }
 0x131   :  { %395 = vsyncpa [#allocation4 + $0x1], 1 }

</bundles_post_ra>
